<compile_context>
chip_gen: v7x
topology: tpu7x:2x2x1
jax: 0.10.0
libtpu: 0.0.40
codegen_flags: <defaults>
</compile_context>

<pallas_src>
import math

import jax
import jax.numpy as jnp
from jax.experimental import pallas as pl
from jax.experimental.pallas import tpu as pltpu


_MAX_DMA_CHUNKS = 4            # 2-4 concurrent DMAs cover issue latency
_MIN_CHUNK_BYTES = 256 * 1024  # don't split copies smaller than this


def _make_dma_copy_kernel(chunks):
    """Kernel copying `x` -> `o` entirely in HBM via len(chunks) overlapped DMAs.

    `chunks` is a static (Python) list of (row_start, row_size) pairs along
    axis 0 of the (identical-shape) HBM refs.  No VMEM, no vregs: pure DMA.
    """
    def kernel(x_hbm, o_hbm, sem):
        copies = []
        for i, (start, size) in enumerate(chunks):
            cp = pltpu.make_async_copy(
                x_hbm.at[pl.ds(start, size)],
                o_hbm.at[pl.ds(start, size)],
                sem.at[i],
            )
            cp.start()            # issue every DMA first so they overlap ...
            copies.append(cp)
        for cp in copies:         # ... then drain them
            cp.wait()
    return kernel


def _pallas_hbm_copy(x_flat):
    """Materialising identity copy of a flat buffer via direct HBM->HBM DMA."""
    total = int(x_flat.size)
    itemsize = x_flat.dtype.itemsize
    total_bytes = total * itemsize

    # Lane-dense 2-D presentation when one exists (metadata-only reshape); the
    # DMA is contiguous either way, this just keeps descriptors tidy and gives
    # clean 128-aligned chunk boundaries.
    cols = None
    for cand in (4096, 2048, 1024, 512, 256, 128):
        if total % cand == 0:
            cols = cand
            break

    if cols is not None:
        rows = total // cols
        src = x_flat.reshape(rows, cols)            # metadata-only
        n_chunks = max(1, min(_MAX_DMA_CHUNKS, rows,
                              total_bytes // _MIN_CHUNK_BYTES))
    else:
        # Ragged size: single whole-buffer 1-D DMA (still a real materialising
        # copy — no silent fallback to the metadata path).
        src = x_flat
        rows = total
        n_chunks = 1

    # Even static split along axis 0 (chunk boundaries are Python ints, so the
    # slices are zero-cost ref views — no tail/masked-store issue at all).
    base, rem = divmod(rows, n_chunks)
    chunks, start = [], 0
    for i in range(n_chunks):
        size = base + (1 if i < rem else 0)
        chunks.append((start, size))
        start += size

    out = pl.pallas_call(
        _make_dma_copy_kernel(chunks),
        out_shape=jax.ShapeDtypeStruct(src.shape, src.dtype),
        in_specs=[pl.BlockSpec(memory_space=pl.ANY)],   # raw HBM ref, no auto-DMA
        out_specs=pl.BlockSpec(memory_space=pl.ANY),    # output written by DMA only
        scratch_shapes=[pltpu.SemaphoreType.DMA((n_chunks,))],
        compiler_params=pltpu.CompilerParams(has_side_effects=True),
        cost_estimate=pl.CostEstimate(
            flops=0, transcendentals=0, bytes_accessed=2 * total_bytes),
    )(src)
    return out.reshape(total)                           # metadata-only


def pallas_reshape(x, shape, *, via_pallas_copy=False):
    """torch `x.view((-1,) + shape)` semantics.

    Default: metadata-only reshape (no HBM traffic) — the correct production
    implementation of a contiguous view.  `via_pallas_copy=True` forces the
    result to be materialised in a fresh HBM buffer via a direct HBM->HBM DMA.
    """
    total = int(x.size)
    tail = math.prod(shape)
    assert tail > 0 and total % tail == 0, "cannot infer leading dimension for view"
    out_shape = (total // tail,) + tuple(shape)

    if not via_pallas_copy:
        return x.reshape(out_shape)        # zero-copy view: no kernel, no HBM traffic

    flat = x.reshape(total)                              # metadata-only flatten
    return _pallas_hbm_copy(flat).reshape(out_shape)     # metadata-only reshape


if __name__ == "__main__":
    # Module under test: Reshape(shape=(16, 64)); forward(x) = x.view((-1, 16, 64))
    key = jax.random.PRNGKey(0)
    k0, k1 = jax.random.split(key)
    target_shape = (16, 64)

    x = jax.random.normal(k0, (2, 4, 16, 16), dtype=jnp.float32)   # NCHW input
    y_ref = x.reshape((-1,) + target_shape)

    # Production path: metadata-only (zero data movement).
    y_fast = pallas_reshape(x, target_shape)
    assert y_fast.shape == y_ref.shape
    assert bool(jnp.array_equal(y_fast, y_ref))

    # Materialisation path: direct HBM->HBM DMA (single chunk at this size).
    y = jax.block_until_ready(pallas_reshape(x, target_shape, via_pallas_copy=True))
    assert y.shape == y_ref.shape, (y.shape, y_ref.shape)
    assert y.dtype == y_ref.dtype
    assert bool(jnp.array_equal(y, y_ref))

    # Larger input to exercise the chunked (4 overlapped DMAs) copy path.
    x2 = jax.random.normal(k1, (4, 4, 128, 128), dtype=jnp.float32)  # 1 MiB
    y2_ref = x2.reshape((-1,) + target_shape)
    y2 = jax.block_until_ready(pallas_reshape(x2, target_shape, via_pallas_copy=True))
    assert y2.shape == y2_ref.shape
    assert bool(jnp.array_equal(y2, y2_ref))

    print("KERNEL_OK")
</pallas_src>

<mosaic_0001>
module attributes {stable_mosaic.version = 11 : i64} {
  func.func @kernel(%arg0: memref<1x2048xf32, #tpu.memory_space<any>>, %arg1: memref<1x2048xf32, #tpu.memory_space<any>>, %arg2: memref<1x!tpu.dma_semaphore, #tpu.memory_space<semaphore_mem>>) attributes {dimension_semantics = [], scalar_prefetch = 0 : i64, scratch_operands = 1 : i64, tpu.core_type = #tpu.core_type<tc>} {
    %c0_i32 = arith.constant 0 : i32
    %c0_i32_0 = arith.constant 0 : i32
    %c0_i32_1 = arith.constant 0 : i32
    %0 = tpu.memref_slice %arg0[%c0_i32_0, %c0_i32_1] : memref<1x2048xf32, #tpu.memory_space<any>> -> memref<1x2048xf32, #tpu.memory_space<any>>
    %c0_i32_2 = arith.constant 0 : i32
    %c0_i32_3 = arith.constant 0 : i32
    %1 = tpu.memref_slice %arg1[%c0_i32_2, %c0_i32_3] : memref<1x2048xf32, #tpu.memory_space<any>> -> memref<1x2048xf32, #tpu.memory_space<any>>
    %2 = tpu.memref_slice %arg2[%c0_i32] : memref<1x!tpu.dma_semaphore, #tpu.memory_space<semaphore_mem>> -> memref<1x!tpu.dma_semaphore, #tpu.memory_space<semaphore_mem>>
    %3 = tpu.memref_squeeze %2 : memref<1x!tpu.dma_semaphore, #tpu.memory_space<semaphore_mem>> -> memref<!tpu.dma_semaphore, #tpu.memory_space<semaphore_mem>>
    tpu.enqueue_dma source(%0 : memref<1x2048xf32, #tpu.memory_space<any>>) target(%1 : memref<1x2048xf32, #tpu.memory_space<any>>) target_semaphore(%3 : memref<!tpu.dma_semaphore, #tpu.memory_space<semaphore_mem>>)
    %c0_i32_4 = arith.constant 0 : i32
    %c0_i32_5 = arith.constant 0 : i32
    %c0_i32_6 = arith.constant 0 : i32
    %4 = tpu.memref_slice %arg0[%c0_i32_5, %c0_i32_6] : memref<1x2048xf32, #tpu.memory_space<any>> -> memref<1x2048xf32, #tpu.memory_space<any>>
    %c0_i32_7 = arith.constant 0 : i32
    %c0_i32_8 = arith.constant 0 : i32
    %5 = tpu.memref_slice %arg1[%c0_i32_7, %c0_i32_8] : memref<1x2048xf32, #tpu.memory_space<any>> -> memref<1x2048xf32, #tpu.memory_space<any>>
    %6 = tpu.memref_slice %arg2[%c0_i32_4] : memref<1x!tpu.dma_semaphore, #tpu.memory_space<semaphore_mem>> -> memref<1x!tpu.dma_semaphore, #tpu.memory_space<semaphore_mem>>
    %7 = tpu.memref_squeeze %6 : memref<1x!tpu.dma_semaphore, #tpu.memory_space<semaphore_mem>> -> memref<!tpu.dma_semaphore, #tpu.memory_space<semaphore_mem>>
    tpu.wait_dma2 semaphore(%7 : memref<!tpu.dma_semaphore, #tpu.memory_space<semaphore_mem>>) src(%4 : memref<1x2048xf32, #tpu.memory_space<any>>) dst(%5 : memref<1x2048xf32, #tpu.memory_space<any>>)
    return
  }
}

</mosaic_0001>

<bundles_post_ra>
// kernel: tpu_custom_call.1
= control target key start
LH: loop header
LB: loop body
LE: loop exit
PB: predicated region body
PF: predicated region fallthrough
CT: control target
= control target key end

     0   :  { %s34_s6 = smov [#allocation2]   ;;  %s35_s7 = smov [#allocation3]   ;;  %s53_s0 = inlined_call_operand.hbm [shape: f32[1,2048], index: 0, kind: input, shape index: {}]   ;;  %s54_s1 = inlined_call_operand.hbm [shape: f32[1,2048], index: 1, kind: output, shape index: {}]  }
   0x1   :  { %s36_s8 = smov 0  }
   0x2   :  { %18 = dma.general %s53_s0, 256, %s54_s1, %s34_s6, %s35_s7, [#allocation4], %s36_s8, 0  }
   0x3   :  { %32 = dma.done.wait [#allocation2], 256 }
   0x4   :  { %33 = vsyncadd [#allocation2], 4294967040 }
   0x5   :  { %22 = vsyncmov [#allocation2] }
   0x8   :  { %s23_s13 = vpop.sfrf %22 }
   0x9   :  { %p28_p0 = scmp.ne.s32.totalorder %s23_s13, 0 }
   0xb   :  { %27 = shalt.err (%p28_p0)  }

</bundles_post_ra>
